<compile_context>
chip_gen: v7x
topology: tpu7x:2x2x1
jax: 0.10.0
libtpu: 0.0.40
codegen_flags: <defaults>
</compile_context>

<pallas_src>
import math

import jax
import jax.numpy as jnp
from jax.experimental import pallas as pl
from jax.experimental.pallas import tpu as pltpu

EPS = 1e-5  # torch.nn.LayerNorm default eps


def _round_up(a, b):
    return ((a + b - 1) // b) * b


def _gelu(h, approx, inv_sqrt2):
    if approx:
        return jax.nn.gelu(h, approximate=True)          # tanh -> EUP slot
    return 0.5 * h * (1.0 + jax.lax.erf(h * inv_sqrt2))  # exact erf (torch default)


def _tpu_caps():
    """(per-TC VMEM capacity bytes, has-2-TensorCores) with defensive fallbacks."""
    vmem_cap = None
    try:
        vmem_cap = int(pltpu.get_tpu_info().vmem_capacity_bytes)
    except Exception:
        vmem_cap = None
    kind = ""
    try:
        kind = (getattr(jax.devices()[0], "device_kind", "") or "").lower()
    except Exception:
        pass
    multi_tc = "v7" in kind
    if vmem_cap is None:
        if "v7" in kind:
            vmem_cap = 64 << 20
        elif "v5" in kind or "v6" in kind:
            vmem_cap = 128 << 20
        else:
            vmem_cap = 64 << 20  # conservative default
    return vmem_cap, multi_tc


# --------------------------------------------------------------------------------------
# Path A: both weight matrices resident in VMEM; grid over row tiles only.
# --------------------------------------------------------------------------------------
def _make_fused_kernel(d_in, d_out, approx_gelu):
    inv_in = 1.0 / d_in
    inv_out = 1.0 / d_out
    inv_sqrt2 = 1.0 / math.sqrt(2.0)

    def kernel(x_ref, w1_ref, b1_ref, w2_ref, b2_ref, g2_ref, beta2_ref, o_ref):
        x = x_ref[...].astype(jnp.float32)

        # LayerNorm(in_dim); gamma/beta already folded into W1/b1.  Padded lanes of x
        # are exactly zero, so unmasked sums / true-count divisors are correct.
        mu = jnp.sum(x, axis=-1, keepdims=True) * inv_in
        var = jnp.sum(x * x, axis=-1, keepdims=True) * inv_in - mu * mu
        xn = (x - mu) * jax.lax.rsqrt(var + EPS)

        # Linear(in_dim, in_dim) on the MXU (f32 accumulation).
        h = jnp.dot(xn.astype(w1_ref.dtype), w1_ref[...],
                    preferred_element_type=jnp.float32) + b1_ref[...]
        h = _gelu(h, approx_gelu, inv_sqrt2)

        # Linear(in_dim, out_dim).
        y = jnp.dot(h.astype(w2_ref.dtype), w2_ref[...],
                    preferred_element_type=jnp.float32) + b2_ref[...]

        # LayerNorm(out_dim); padded columns of W2/b2 are zero so padded lanes of y
        # are exactly zero.
        mu2 = jnp.sum(y, axis=-1, keepdims=True) * inv_out
        var2 = jnp.sum(y * y, axis=-1, keepdims=True) * inv_out - mu2 * mu2
        o_ref[...] = ((y - mu2) * jax.lax.rsqrt(var2 + EPS) * g2_ref[...]
                      + beta2_ref[...]).astype(o_ref.dtype)

    return kernel


# --------------------------------------------------------------------------------------
# Path B: K-streamed weights.  Grid = (row tiles, hidden-dim tiles).  Per k:
#   h_k = GELU(xn @ W1[:, k] + b1[k]);  acc += h_k @ W2[k, :];  LN2 at k == last.
# --------------------------------------------------------------------------------------
def _make_stream_kernel(d_in, d_out, approx_gelu):
    inv_in = 1.0 / d_in
    inv_out = 1.0 / d_out
    inv_sqrt2 = 1.0 / math.sqrt(2.0)

    def kernel(x_ref, w1_ref, b1_ref, w2_ref, b2_ref, g2_ref, beta2_ref, o_ref,
               xn_ref, acc_ref):
        k = pl.program_id(1)

        @pl.when(k == 0)
        def _():
            x = x_ref[...].astype(jnp.float32)
            mu = jnp.sum(x, axis=-1, keepdims=True) * inv_in
            var = jnp.sum(x * x, axis=-1, keepdims=True) * inv_in - mu * mu
            xn_ref[...] = ((x - mu) * jax.lax.rsqrt(var + EPS)).astype(xn_ref.dtype)
            acc_ref[...] = jnp.zeros_like(acc_ref)

        h = jnp.dot(xn_ref[...], w1_ref[...],
                    preferred_element_type=jnp.float32) + b1_ref[...]
        h = _gelu(h, approx_gelu, inv_sqrt2)
        acc_ref[...] += jnp.dot(h.astype(w2_ref.dtype), w2_ref[...],
                                preferred_element_type=jnp.float32)

        @pl.when(k == pl.num_programs(1) - 1)
        def _():
            y = acc_ref[...] + b2_ref[...]
            mu2 = jnp.sum(y, axis=-1, keepdims=True) * inv_out
            var2 = jnp.sum(y * y, axis=-1, keepdims=True) * inv_out - mu2 * mu2
            o_ref[...] = ((y - mu2) * jax.lax.rsqrt(var2 + EPS) * g2_ref[...]
                          + beta2_ref[...]).astype(o_ref.dtype)

    return kernel


def mlp_proj(x, params, *, tm=None, tk=None, matmul_dtype="auto",
             approx_gelu=False, force_stream=False):
    """x: (B, L, in_dim) -> (B, L, out_dim).  LN -> Linear -> GELU -> Linear -> LN."""
    B, L, d_in = x.shape
    d_out = params["w2"].shape[1]
    n = B * L
    xb = jnp.dtype(x.dtype).itemsize

    if isinstance(matmul_dtype, str) and matmul_dtype == "auto":
        # All TPU MXU generations are bf16-native; f32 operands run far below peak and
        # double weight HBM/VMEM traffic.  Accumulation stays f32.
        matmul_dtype = jnp.bfloat16
    wdt = jnp.dtype(matmul_dtype)
    wb = wdt.itemsize

    d_in_p = _round_up(d_in, 128)
    d_out_p = _round_up(d_out, 128)

    # ---- parameter prep (trace-time, once): fold LN1 affine into W1/b1, zero-pad the
    # feature dims to lane-dense multiples of 128, cast matmul operands ----
    w1 = params["g1"][0][:, None] * params["w1"]
    b1 = params["b1"][0] @ params["w1"] + params["bb1"][0]
    w1 = jnp.pad(w1, ((0, d_in_p - d_in), (0, d_in_p - d_in))).astype(wdt)
    b1 = jnp.pad(b1, (0, d_in_p - d_in)).reshape(1, d_in_p).astype(jnp.float32)
    w2 = jnp.pad(params["w2"], ((0, d_in_p - d_in), (0, d_out_p - d_out))).astype(wdt)
    b2 = jnp.pad(params["bb2"][0], (0, d_out_p - d_out)).reshape(1, d_out_p).astype(jnp.float32)
    g2 = jnp.pad(params["g2"][0], (0, d_out_p - d_out)).reshape(1, d_out_p).astype(jnp.float32)
    beta2 = jnp.pad(params["b2"][0], (0, d_out_p - d_out)).reshape(1, d_out_p).astype(jnp.float32)

    # Only the feature dim of x needs padding (lane-dense loads); the row dim is handled
    # by a cdiv grid with Pallas boundary-block masking (no extra HBM copy of x).
    xf = x.reshape(n, d_in)
    if d_in_p != d_in:
        xf = jnp.pad(xf, ((0, 0), (0, d_in_p - d_in)))

    vmem_cap, multi_tc = _tpu_caps()
    vmem_budget = int(0.85 * vmem_cap)

    # Resident-weight cost: weights counted ONCE (single-buffered); each TC on v7x holds
    # its own copy, so everything is sized against the per-TC capacity.
    w_resident = (d_in_p * d_in_p + d_in_p * d_out_p) * wb + 4 * (d_in_p + 3 * d_out_p)
    # per-row bytes: x (double-buffered) + out (double-buffered) + f32 temporaries.
    per_row_fused = 2 * d_in_p * 4 + 2 * d_out_p * xb + 4 * (3 * d_in_p + 2 * d_out_p)

    use_stream = force_stream or (w_resident + 8 * per_row_fused + (2 << 20) > vmem_budget)
    n8 = _round_up(max(n, 8), 8)

    flops = int(2 * n * d_in_p * (d_in_p + d_out_p) + 12 * n * (d_in_p + d_out_p))
    bytes_accessed = int(xb * n * (d_in_p + d_out_p)
                         + (d_in_p * d_in_p + d_in_p * d_out_p) * wb
                         + 4 * (d_in_p + 3 * d_out_p))
    cost = pl.CostEstimate(flops=flops, transcendentals=int(n * d_in_p),
                           bytes_accessed=bytes_accessed)

    if not use_stream:
        # -------------------- Path A: resident weights --------------------
        if tm is None:
            tm = 256 if multi_tc else 512           # bigger tiles on 1-TC / 128 MiB chips
        tm_fit = (vmem_budget - w_resident - (2 << 20)) // per_row_fused
        tm_fit = max(8, (tm_fit // 8) * 8)
        tm = max(8, min(_round_up(tm, 8), tm_fit, n8))
        # keep >= 2 grid steps only where there are 2 TensorCores to feed (v7x)
        if multi_tc and n > 8 and pl.cdiv(n, tm) < 2:
            tm = max(8, _round_up(pl.cdiv(n, 2), 8))
        grid = (pl.cdiv(n, tm),)

        def const_spec(shape):
            # Fetched once (constant block index); single-buffered to halve footprint.
            return pl.BlockSpec(shape, lambda i: (0, 0),
                                pipeline_mode=pl.Buffered(buffer_count=1))

        vmem_needed = w_resident + tm * per_row_fused + (2 << 20)
        vmem_limit = int(min(max(vmem_needed, 16 << 20), vmem_cap))

        out = pl.pallas_call(
            _make_fused_kernel(d_in, d_out, approx_gelu),
            out_shape=jax.ShapeDtypeStruct((n, d_out_p), x.dtype),
            grid_spec=pltpu.PrefetchScalarGridSpec(
                num_scalar_prefetch=0,
                grid=grid,
                in_specs=[
                    pl.BlockSpec((tm, d_in_p), lambda i: (i, 0)),  # x rows (double-buffered)
                    const_spec((d_in_p, d_in_p)),                  # W1 (LN1 affine folded in)
                    const_spec((1, d_in_p)),                       # b1 (folded)
                    const_spec((d_in_p, d_out_p)),                 # W2
                    const_spec((1, d_out_p)),                      # b2
                    const_spec((1, d_out_p)),                      # LN2 gamma
                    const_spec((1, d_out_p)),                      # LN2 beta
                ],
                out_specs=pl.BlockSpec((tm, d_out_p), lambda i: (i, 0)),
            ),
            compiler_params=pltpu.CompilerParams(
                dimension_semantics=("parallel",),
                vmem_limit_bytes=vmem_limit),
            cost_estimate=cost,
        )(xf, w1, b1, w2, b2, g2, beta2)
    else:
        # -------------------- Path B: K-streamed weights --------------------
        if tm is None:
            tm = 256
        tm = max(8, min(_round_up(tm, 8), n8))
        if tk is None:
            tk = 128
            for c in (8, 6, 4, 3, 2, 1):            # largest 128-multiple dividing d_in_p
                if (d_in_p // 128) % c == 0:
                    tk = c * 128
                    break
        assert d_in_p % tk == 0

        def stream_bytes(tm_, tk_):
            return (2 * tm_ * d_in_p * 4                       # x (double-buffered)
                    + 2 * tm_ * d_out_p * xb                   # out (double-buffered)
                    + 2 * (d_in_p * tk_ + tk_ * d_out_p) * wb  # W1 / W2 tiles (db)
                    + tm_ * d_in_p * wb                        # xn scratch
                    + tm_ * d_out_p * 4                        # f32 accumulator
                    + 4 * (2 * tm_ * tk_ + tm_ * d_out_p)      # h / partial temporaries
                    + 4 * (tk_ + 3 * d_out_p))                 # bias / affine vectors
        while tm > 8 and stream_bytes(tm, tk) + (2 << 20) > vmem_budget:
            tm = max(8, ((tm // 2) // 8) * 8)
        if stream_bytes(tm, tk) + (2 << 20) > vmem_budget and tk > 128:
            tk = 128

        grid = (pl.cdiv(n, tm), d_in_p // tk)
        vmem_limit = int(min(max(stream_bytes(tm, tk) + (4 << 20), 16 << 20), vmem_cap))

        def const_spec2(shape):
            return pl.BlockSpec(shape, lambda i, k: (0, 0),
                                pipeline_mode=pl.Buffered(buffer_count=1))

        out = pl.pallas_call(
            _make_stream_kernel(d_in, d_out, approx_gelu),
            out_shape=jax.ShapeDtypeStruct((n, d_out_p), x.dtype),
            grid_spec=pltpu.PrefetchScalarGridSpec(
                num_scalar_prefetch=0,
                grid=grid,
                in_specs=[
                    pl.BlockSpec((tm, d_in_p), lambda i, k: (i, 0)),   # x rows
                    pl.BlockSpec((d_in_p, tk), lambda i, k: (0, k)),   # W1 column tile
                    pl.BlockSpec((1, tk), lambda i, k: (0, k)),        # b1 tile
                    pl.BlockSpec((tk, d_out_p), lambda i, k: (k, 0)),  # W2 row tile
                    const_spec2((1, d_out_p)),                         # b2
                    const_spec2((1, d_out_p)),                         # LN2 gamma
                    const_spec2((1, d_out_p)),                         # LN2 beta
                ],
                out_specs=pl.BlockSpec((tm, d_out_p), lambda i, k: (i, 0)),
                scratch_shapes=[pltpu.VMEM((tm, d_in_p), wdt),          # xn
                                pltpu.VMEM((tm, d_out_p), jnp.float32)],  # accumulator
            ),
            compiler_params=pltpu.CompilerParams(
                dimension_semantics=("parallel", "arbitrary"),
                vmem_limit_bytes=vmem_limit),
            cost_estimate=cost,
        )(xf, w1, b1, w2, b2, g2, beta2)

    return out[:, :d_out].reshape(B, L, d_out)


def init_params(key, in_dim, out_dim):
    k1, k2, k3, k4 = jax.random.split(key, 4)
    scale1 = 1.0 / math.sqrt(in_dim)
    return {
        "g1": jnp.ones((1, in_dim), jnp.float32),
        "b1": jnp.zeros((1, in_dim), jnp.float32),
        "w1": jax.random.uniform(k1, (in_dim, in_dim), jnp.float32, -scale1, scale1),
        "bb1": jax.random.uniform(k2, (1, in_dim), jnp.float32, -scale1, scale1),
        "w2": jax.random.uniform(k3, (in_dim, out_dim), jnp.float32, -scale1, scale1),
        "bb2": jax.random.uniform(k4, (1, out_dim), jnp.float32, -scale1, scale1),
        "g2": jnp.ones((1, out_dim), jnp.float32),
        "b2": jnp.zeros((1, out_dim), jnp.float32),
    }


def mlp_proj_ref(x, p):
    """Pure-JAX reference matching the PyTorch module semantics."""
    def ln(v, g, b):
        mu = jnp.mean(v, axis=-1, keepdims=True)
        var = jnp.mean((v - mu) ** 2, axis=-1, keepdims=True)
        return (v - mu) * jax.lax.rsqrt(var + EPS) * g[0] + b[0]

    h = ln(x, p["g1"], p["b1"])
    h = h @ p["w1"] + p["bb1"][0]
    h = jax.nn.gelu(h, approximate=False)
    h = h @ p["w2"] + p["bb2"][0]
    return ln(h, p["g2"], p["b2"])


if __name__ == "__main__":
    keys = jax.random.split(jax.random.PRNGKey(0), 6)

    # 1) Small config, non-multiple-of-128 dims (padded path).
    B, L, IN_DIM, OUT_DIM = 2, 8, 32, 64
    x = jax.random.normal(keys[0], (B, L, IN_DIM), jnp.float32)
    params = init_params(keys[1], IN_DIM, OUT_DIM)
    ref = mlp_proj_ref(x, params)

    out_f32 = jax.block_until_ready(mlp_proj(x, params, matmul_dtype=jnp.float32))
    assert out_f32.shape == (B, L, OUT_DIM)
    assert jnp.allclose(out_f32, ref, atol=1e-5, rtol=1e-5), "f32 mismatch vs reference"

    out_bf16 = jax.block_until_ready(mlp_proj(x, params))  # default: bf16 MXU operands
    assert jnp.allclose(out_bf16, ref, atol=5e-2, rtol=5e-2), "bf16 mismatch vs reference"

    # 2) Lane-dense config (multiples of 128 -> no feature padding), default bf16 path.
    B2, L2, IN2, OUT2 = 1, 16, 128, 256
    x2 = jax.random.normal(keys[2], (B2, L2, IN2), jnp.float32)
    params2 = init_params(keys[3], IN2, OUT2)
    out2 = jax.block_until_ready(mlp_proj(x2, params2))
    ref2 = mlp_proj_ref(x2, params2)
    assert out2.shape == (B2, L2, OUT2)
    assert jnp.allclose(out2, ref2, atol=5e-2, rtol=5e-2), "bf16 mismatch (128-dim)"

    # 3) K-streamed path (forced here; chosen automatically for large d_in on v7x).
    B3, L3, IN3, OUT3 = 2, 8, 256, 192
    x3 = jax.random.normal(keys[4], (B3, L3, IN3), jnp.float32)
    params3 = init_params(keys[5], IN3, OUT3)
    out3 = jax.block_until_ready(
        mlp_proj(x3, params3, matmul_dtype=jnp.float32, force_stream=True, tk=128))
    ref3 = mlp_proj_ref(x3, params3)
    assert out3.shape == (B3, L3, OUT3)
    assert jnp.allclose(out3, ref3, atol=1e-3, rtol=1e-3), "mismatch (streamed path)"

    print("KERNEL_OK")
</pallas_src>

<mosaic_0001>
module attributes {stable_mosaic.version = 11 : i64} {
  func.func @kernel(%arg0: i32, %arg1: memref<16x128xf32, #tpu.memory_space<vmem>>, %arg2: memref<128x128xf32, #tpu.memory_space<vmem>>, %arg3: memref<1x128xf32, #tpu.memory_space<vmem>>, %arg4: memref<128x128xf32, #tpu.memory_space<vmem>>, %arg5: memref<1x128xf32, #tpu.memory_space<vmem>>, %arg6: memref<1x128xf32, #tpu.memory_space<vmem>>, %arg7: memref<1x128xf32, #tpu.memory_space<vmem>>, %arg8: memref<16x128xf32, #tpu.memory_space<vmem>>) attributes {dimension_semantics = [#tpu.dimension_semantics<parallel>], iteration_bounds = array<i64: 1>, scalar_prefetch = 0 : i64, scratch_operands = 0 : i64, tpu.core_type = #tpu.core_type<tc>, window_params = [{transform_indices = @transform_0, window_bounds = array<i64: 16, 128>}, {pipeline_mode = #tpu.pipeline_mode<synchronous>, transform_indices = @transform_1, window_bounds = array<i64: 128, 128>}, {pipeline_mode = #tpu.pipeline_mode<synchronous>, transform_indices = @transform_2, window_bounds = array<i64: 1, 128>}, {pipeline_mode = #tpu.pipeline_mode<synchronous>, transform_indices = @transform_3, window_bounds = array<i64: 128, 128>}, {pipeline_mode = #tpu.pipeline_mode<synchronous>, transform_indices = @transform_4, window_bounds = array<i64: 1, 128>}, {pipeline_mode = #tpu.pipeline_mode<synchronous>, transform_indices = @transform_5, window_bounds = array<i64: 1, 128>}, {pipeline_mode = #tpu.pipeline_mode<synchronous>, transform_indices = @transform_6, window_bounds = array<i64: 1, 128>}, {transform_indices = @transform_7, window_bounds = array<i64: 16, 128>}]} {
    %c0 = arith.constant 0 : index
    %c0_0 = arith.constant 0 : index
    %0 = vector.load %arg1[%c0, %c0_0] : memref<16x128xf32, #tpu.memory_space<vmem>>, vector<16x128xf32>
    %cst = arith.constant dense<0.000000e+00> : vector<16xf32>
    %1 = vector.multi_reduction <add>, %0, %cst [1] : vector<16x128xf32> to vector<16xf32>
    %2 = vector.shape_cast %1 : vector<16xf32> to vector<16x1xf32>
    %cst_1 = arith.constant 3.125000e-02 : f32
    %3 = vector.broadcast %cst_1 : f32 to vector<16x1xf32>
    %4 = arith.mulf %2, %3 : vector<16x1xf32>
    %5 = arith.mulf %0, %0 : vector<16x128xf32>
    %cst_2 = arith.constant dense<0.000000e+00> : vector<16xf32>
    %6 = vector.multi_reduction <add>, %5, %cst_2 [1] : vector<16x128xf32> to vector<16xf32>
    %7 = vector.shape_cast %6 : vector<16xf32> to vector<16x1xf32>
    %cst_3 = arith.constant 3.125000e-02 : f32
    %8 = vector.broadcast %cst_3 : f32 to vector<16x1xf32>
    %9 = arith.mulf %7, %8 : vector<16x1xf32>
    %10 = arith.mulf %4, %4 : vector<16x1xf32>
    %11 = arith.subf %9, %10 : vector<16x1xf32>
    %12 = vector.broadcast %4 : vector<16x1xf32> to vector<16x128xf32>
    %13 = arith.subf %0, %12 : vector<16x128xf32>
    %cst_4 = arith.constant 9.99999974E-6 : f32
    %14 = vector.broadcast %cst_4 : f32 to vector<16x1xf32>
    %15 = arith.addf %11, %14 : vector<16x1xf32>
    %16 = math.rsqrt %15 : vector<16x1xf32>
    %17 = vector.broadcast %16 : vector<16x1xf32> to vector<16x128xf32>
    %18 = arith.mulf %13, %17 : vector<16x128xf32>
    %c0_5 = arith.constant 0 : index
    %c0_6 = arith.constant 0 : index
    %19 = vector.load %arg2[%c0_5, %c0_6] : memref<128x128xf32, #tpu.memory_space<vmem>>, vector<128x128xf32>
    %cst_7 = arith.constant dense<0.000000e+00> : vector<16x128xf32>
    %20 = tpu.matmul %18, %19, %cst_7 {dimension_numbers = #tpu.dot_dimension_numbers<[1], [0], [0], [1], [0, 0, 1, 1], [], []>} : vector<16x128xf32>, vector<128x128xf32>, vector<16x128xf32> -> vector<16x128xf32>
    %c0_8 = arith.constant 0 : index
    %c0_9 = arith.constant 0 : index
    %21 = vector.load %arg3[%c0_8, %c0_9] : memref<1x128xf32, #tpu.memory_space<vmem>>, vector<1x128xf32>
    %22 = vector.broadcast %21 : vector<1x128xf32> to vector<16x128xf32>
    %23 = arith.addf %20, %22 : vector<16x128xf32>
    %cst_10 = arith.constant 5.000000e-01 : f32
    %24 = vector.broadcast %cst_10 : f32 to vector<16x128xf32>
    %25 = arith.mulf %24, %23 : vector<16x128xf32>
    %cst_11 = arith.constant 0.707106769 : f32
    %26 = vector.broadcast %cst_11 : f32 to vector<16x128xf32>
    %27 = arith.mulf %23, %26 : vector<16x128xf32>
    %28 = math.erf %27 : vector<16x128xf32>
    %cst_12 = arith.constant 1.000000e+00 : f32
    %29 = vector.broadcast %cst_12 : f32 to vector<16x128xf32>
    %30 = arith.addf %29, %28 : vector<16x128xf32>
    %31 = arith.mulf %25, %30 : vector<16x128xf32>
    %c0_13 = arith.constant 0 : index
    %c0_14 = arith.constant 0 : index
    %32 = vector.load %arg4[%c0_13, %c0_14] : memref<128x128xf32, #tpu.memory_space<vmem>>, vector<128x128xf32>
    %cst_15 = arith.constant dense<0.000000e+00> : vector<16x128xf32>
    %33 = tpu.matmul %31, %32, %cst_15 {dimension_numbers = #tpu.dot_dimension_numbers<[1], [0], [0], [1], [0, 0, 1, 1], [], []>} : vector<16x128xf32>, vector<128x128xf32>, vector<16x128xf32> -> vector<16x128xf32>
    %c0_16 = arith.constant 0 : index
    %c0_17 = arith.constant 0 : index
    %34 = vector.load %arg5[%c0_16, %c0_17] : memref<1x128xf32, #tpu.memory_space<vmem>>, vector<1x128xf32>
    %35 = vector.broadcast %34 : vector<1x128xf32> to vector<16x128xf32>
    %36 = arith.addf %33, %35 : vector<16x128xf32>
    %cst_18 = arith.constant dense<0.000000e+00> : vector<16xf32>
    %37 = vector.multi_reduction <add>, %36, %cst_18 [1] : vector<16x128xf32> to vector<16xf32>
    %38 = vector.shape_cast %37 : vector<16xf32> to vector<16x1xf32>
    %cst_19 = arith.constant 1.562500e-02 : f32
    %39 = vector.broadcast %cst_19 : f32 to vector<16x1xf32>
    %40 = arith.mulf %38, %39 : vector<16x1xf32>
    %41 = arith.mulf %36, %36 : vector<16x128xf32>
    %cst_20 = arith.constant dense<0.000000e+00> : vector<16xf32>
    %42 = vector.multi_reduction <add>, %41, %cst_20 [1] : vector<16x128xf32> to vector<16xf32>
    %43 = vector.shape_cast %42 : vector<16xf32> to vector<16x1xf32>
    %cst_21 = arith.constant 1.562500e-02 : f32
    %44 = vector.broadcast %cst_21 : f32 to vector<16x1xf32>
    %45 = arith.mulf %43, %44 : vector<16x1xf32>
    %46 = arith.mulf %40, %40 : vector<16x1xf32>
    %47 = arith.subf %45, %46 : vector<16x1xf32>
    %48 = vector.broadcast %40 : vector<16x1xf32> to vector<16x128xf32>
    %49 = arith.subf %36, %48 : vector<16x128xf32>
    %cst_22 = arith.constant 9.99999974E-6 : f32
    %50 = vector.broadcast %cst_22 : f32 to vector<16x1xf32>
    %51 = arith.addf %47, %50 : vector<16x1xf32>
    %52 = math.rsqrt %51 : vector<16x1xf32>
    %53 = vector.broadcast %52 : vector<16x1xf32> to vector<16x128xf32>
    %54 = arith.mulf %49, %53 : vector<16x128xf32>
    %c0_23 = arith.constant 0 : index
    %c0_24 = arith.constant 0 : index
    %55 = vector.load %arg6[%c0_23, %c0_24] : memref<1x128xf32, #tpu.memory_space<vmem>>, vector<1x128xf32>
    %56 = vector.broadcast %55 : vector<1x128xf32> to vector<16x128xf32>
    %57 = arith.mulf %54, %56 : vector<16x128xf32>
    %c0_25 = arith.constant 0 : index
    %c0_26 = arith.constant 0 : index
    %58 = vector.load %arg7[%c0_25, %c0_26] : memref<1x128xf32, #tpu.memory_space<vmem>>, vector<1x128xf32>
    %59 = vector.broadcast %58 : vector<1x128xf32> to vector<16x128xf32>
    %60 = arith.addf %57, %59 : vector<16x128xf32>
    %c0_27 = arith.constant 0 : index
    %c0_28 = arith.constant 0 : index
    %61 = vector.load %arg8[%c0_27, %c0_28] : memref<16x128xf32, #tpu.memory_space<vmem>>, vector<16x128xf32>
    tpu.vector_store %arg8[%c0_27, %c0_28], %60 {strides = array<i32>} : memref<16x128xf32, #tpu.memory_space<vmem>>, vector<16x128xf32>,
    return
  }
  func.func @transform_0(%arg0: i32) -> (i32, i32) {
    %c0_i32 = arith.constant 0 : i32
    %c0_i32_0 = arith.constant 0 : i32
    return %arg0, %c0_i32 : i32, i32
  }
  func.func @transform_1(%arg0: i32) -> (i32, i32) {
    %c0_i32 = arith.constant 0 : i32
    %c0_i32_0 = arith.constant 0 : i32
    %c0_i32_1 = arith.constant 0 : i32
    return %c0_i32, %c0_i32_0 : i32, i32
  }
  func.func @transform_2(%arg0: i32) -> (i32, i32) {
    %c0_i32 = arith.constant 0 : i32
    %c0_i32_0 = arith.constant 0 : i32
    %c0_i32_1 = arith.constant 0 : i32
    return %c0_i32, %c0_i32_0 : i32, i32
  }
  func.func @transform_3(%arg0: i32) -> (i32, i32) {
    %c0_i32 = arith.constant 0 : i32
    %c0_i32_0 = arith.constant 0 : i32
    %c0_i32_1 = arith.constant 0 : i32
    return %c0_i32, %c0_i32_0 : i32, i32
  }
  func.func @transform_4(%arg0: i32) -> (i32, i32) {
    %c0_i32 = arith.constant 0 : i32
    %c0_i32_0 = arith.constant 0 : i32
    %c0_i32_1 = arith.constant 0 : i32
    return %c0_i32, %c0_i32_0 : i32, i32
  }
  func.func @transform_5(%arg0: i32) -> (i32, i32) {
    %c0_i32 = arith.constant 0 : i32
    %c0_i32_0 = arith.constant 0 : i32
    %c0_i32_1 = arith.constant 0 : i32
    return %c0_i32, %c0_i32_0 : i32, i32
  }
  func.func @transform_6(%arg0: i32) -> (i32, i32) {
    %c0_i32 = arith.constant 0 : i32
    %c0_i32_0 = arith.constant 0 : i32
    %c0_i32_1 = arith.constant 0 : i32
    return %c0_i32, %c0_i32_0 : i32, i32
  }
  func.func @transform_7(%arg0: i32) -> (i32, i32) {
    %c0_i32 = arith.constant 0 : i32
    %c0_i32_0 = arith.constant 0 : i32
    return %arg0, %c0_i32 : i32, i32
  }
}

</mosaic_0001>

<bundles_post_ra>
// kernel: tpu_custom_call.1
= control target key start
LH: loop header
LB: loop body
LE: loop exit
PB: predicated region body
PF: predicated region fallthrough
CT: control target
= control target key end

     0   :  { %12 = vsyncpa [#allocation3], 0  ;;  %s789_s0 = inlined_call_operand.hbm [shape: f32[16,128], index: 0, kind: input, shape index: {}]   ;;  %s790_s1 = inlined_call_operand.hbm [shape: f32[128,128], index: 1, kind: input, shape index: {}]   ;;  %s791_s2 = inlined_call_operand.vmem [shape: f32[1,128], index: 2, kind: input, shape index: {}]   ;;  %s792_s3 = inlined_call_operand.hbm [shape: f32[128,128], index: 3, kind: input, shape index: {}]   ;;  %s793_s4 = inlined_call_operand.vmem [shape: f32[1,128], index: 4, kind: input, shape index: {}]   ;;  %s794_s5 = inlined_call_operand.vmem [shape: f32[1,128], index: 5, kind: input, shape index: {}]   ;;  %s795_s6 = inlined_call_operand.vmem [shape: f32[1,128], index: 6, kind: input, shape index: {}]   ;;  %s796_s7 = inlined_call_operand.hbm [shape: f32[16,128], index: 7, kind: output, shape index: {}]  }
   0x1   :  { %13 = vsyncpa [#allocation6], 0 }
   0x2   :  { %14 = vsyncpa [#allocation4], 0  ;;  %s652_s24 = smov [#allocation5]   ;;  %s653_s26 = smov [#allocation2]  }
   0x3   :  { %s32_s25 = sshll.u32 %s652_s24, 4  ;;  %s20_s27 = sshll.u32 %s653_s26, 4  ;;  %s33_s25 = int_to_ptr.vmem [resolvable:$true] %s32_s25  ;;  %s698_s27 = int_to_ptr.vmem [resolvable:$true] %s20_s27 }
   0x4   :  { %s558_s30 = scalar_lea.hbm %s790_s1, 2048 }
   0x5   :  { %p559_p0 = scmp.ne.s32.totalorder %s790_s1, %s558_s30  ;;  %p562_p1 = scmp.lt.u32.totalorder %s558_s30, %s790_s1 }
   0x7   :  { %p564_p2 = pnand %p562_p1, %p559_p0 }
   0x9   :  { %567 = shalt.err (!%p564_p2)
}
   0xa   :  { %s568_s12 = scalar_lea.vmem %s33_s25, 2048  ;;  %p573_p4 = scmp.lt.s32.totalorder %s33_s25, %s33_s25 }
   0xb   :  { %p569_p3 = scmp.ne.s32.totalorder %s33_s25, %s568_s12  ;;  %p574_p5 = scmp.lt.s32.totalorder %s568_s12, %s568_s12 }
   0xd   :  { %p575_p6 = por %p574_p5, %p573_p4 }
   0xf   :  { %p576_p7 = pnand %p575_p6, %p569_p3 }
  0x11   :  { %579 = shalt.err (!%p576_p7)
}
  0x12   :  { %s654_s13 = smov 128   ;;  %s655_s14 = smov 8  }
  0x13   :  { %38 = dma.hbm_to_vmem [thread:$0]  %s790_s1, 2048, %s33_s25, [#allocation6], %s654_s13, %s654_s13, %s655_s14  }
  0x14   :  { %s580_s19 = scalar_lea.hbm %s789_s0, 256 }
  0x15   :  { %p581_p8 = scmp.ne.s32.totalorder %s789_s0, %s580_s19  ;;  %p584_p9 = scmp.lt.u32.totalorder %s580_s19, %s789_s0 }
  0x17   :  { %p586_p10 = pnand %p584_p9, %p581_p8 }
  0x19   :  { %589 = shalt.err (!%p586_p10)
}
  0x1a   :  { %s590_s24 = scalar_lea.vmem %s698_s27, 256  ;;  %p595_p12 = scmp.lt.s32.totalorder %s698_s27, %s698_s27 }
  0x1b   :  { %p591_p11 = scmp.ne.s32.totalorder %s698_s27, %s590_s24  ;;  %p596_p13 = scmp.lt.s32.totalorder %s590_s24, %s590_s24 }
  0x1d   :  { %p597_p0 = por %p596_p13, %p595_p12 }
  0x1f   :  { %p598_p1 = pnand %p597_p0, %p591_p11 }
  0x21   :  { %601 = shalt.err (!%p598_p1)
}
  0x22   :  { %26 = dma.hbm_to_vmem [thread:$0]  %s789_s0, 256, %s698_s27, [#allocation3], %s654_s13, %s654_s13, %s655_s14  }
  0x23   :  { %s656_s26 = smov [#allocation7]   ;;  %s602_s8 = scalar_lea.hbm %s792_s3, 2048 }
  0x24   :  { %s46_s28 = sshll.u32 %s656_s26, 4  ;;  %p603_p2 = scmp.ne.s32.totalorder %s792_s3, %s602_s8  ;;  %s47_s28 = int_to_ptr.vmem [resolvable:$true] %s46_s28 }
  0x25   :  { %p606_p3 = scmp.lt.u32.totalorder %s602_s8, %s792_s3 }
  0x27   :  { %p608_p4 = pnand %p606_p3, %p603_p2 }
  0x29   :  { %611 = shalt.err (!%p608_p4)
}
  0x2a   :  { %s612_s15 = scalar_lea.vmem %s47_s28, 2048  ;;  %p617_p6 = scmp.lt.s32.totalorder %s47_s28, %s47_s28 }
  0x2b   :  { %p613_p5 = scmp.ne.s32.totalorder %s47_s28, %s612_s15  ;;  %p618_p7 = scmp.lt.s32.totalorder %s612_s15, %s612_s15 }
  0x2d   :  { %p619_p8 = por %p618_p7, %p617_p6 }
  0x2f   :  { %p620_p9 = pnand %p619_p8, %p613_p5 }
  0x31   :  { %623 = shalt.err (!%p620_p9)
}
  0x32   :  { %52 = dma.hbm_to_vmem [thread:$0]  %s792_s3, 2048, %s47_s28, [#allocation6], %s654_s13, %s654_s13, %s655_s14  }
  0x33   :  { %646 = dma.done.wait [#allocation3], 256  }
  0x34   :  { %647 = vsyncadd [#allocation3], 4294967040 }
  0x35   :  { %648 = dma.done.wait [#allocation6], 4096  }
  0x36   :  { %649 = vsyncadd [#allocation6], 4294963200  ;;  %v750_v0 = vld [vmem:[#allocation2] sm:$0xff]  ;;  %v752_v1 = vld [vmem:[#allocation2 + $0x8] sm:$0xff]  ;;  %s657_s21 = smov [#allocation8]  }
  0x37   :  { %v96_v2 = vld [vmem:[#allocation5] sm:$0xff]  ;;  %70 = vadd.xlane.f32.xlu0 %v750_v0  ;;  %v76_v3 = vmul.f32 %v750_v0, %v750_v0  ;;  %v97_v4 = vld [vmem:[#allocation5 + $0x8] sm:$0xff]  ;;  %v98_v5 = vld [vmem:[#allocation5 + $0x10] sm:$0xff]  ;;  %v77_v9 = vmul.f32 %v752_v1, %v752_v1  ;;  %s353_s22 = sshll.u32 %s657_s21, 4  ;;  %s354_s22 = int_to_ptr.vmem [resolvable:$true] %s353_s22 }
  0x38   :  { %v99_v6 = vld [vmem:[#allocation5 + $0x18] sm:$0xff]  ;;  %v476_v7 = vpack.c.bf16 %v97_v4, %v96_v2  ;;  %v100_v10 = vld [vmem:[#allocation5 + $0x20] sm:$0xff]  ;;  %v101_v11 = vld [vmem:[#allocation5 + $0x28] sm:$0xff]  ;;  %s624_s23 = scalar_lea.vmem %s354_s22, 256  ;;  %p629_p11 = scmp.lt.s32.totalorder %s354_s22, %s354_s22 }
  0x39   :  { %v480_v8 = vpack.c.bf16 %v99_v6, %v98_v5  ;;  %78 = vadd.xlane.f32.xlu1 %v76_v3  ;;  %v484_v12 = vpack.c.bf16 %v101_v11, %v100_v10  ;;  %v102_v13 = vld [vmem:[#allocation5 + $0x30] sm:$0xff]  ;;  %v103_v14 = vld [vmem:[#allocation5 + $0x38] sm:$0xff]  ;;  %v104_v16 = vld [vmem:[#allocation5 + $0x40] sm:$0xff]  ;;  %p625_p10 = scmp.ne.s32.totalorder %s354_s22, %s624_s23  ;;  %p630_p12 = scmp.lt.s32.totalorder %s624_s23, %s624_s23 }
  0x3a   :  { %477 = vmatprep.subr.bf16.mxu0 %v476_v7  ;;  %v488_v15 = vpack.c.bf16 %v103_v14, %v102_v13  ;;  %v105_v17 = vld [vmem:[#allocation5 + $0x48] sm:$0xff]  ;;  %v106_v19 = vld [vmem:[#allocation5 + $0x50] sm:$0xff]  ;;  %v107_v20 = vld [vmem:[#allocation5 + $0x58] sm:$0xff] }
  0x3b   :  { %72 = vadd.xlane.f32.xlu0 %v752_v1  ;;  %479 = vmatpush3.bf16.msra.mxu0 %v476_v7  ;;  %v492_v18 = vpack.c.bf16 %v105_v17, %v104_v16  ;;  %v496_v21 = vpack.c.bf16 %v107_v20, %v106_v19  ;;  %v108_v22 = vld [vmem:[#allocation5 + $0x60] sm:$0xff]  ;;  %v109_v23 = vld [vmem:[#allocation5 + $0x68] sm:$0xff]  ;;  %v110_v24 = vld [vmem:[#allocation5 + $0x70] sm:$0xff]  ;;  %p631_p13 = por %p630_p12, %p629_p11 }
  0x3c   :  { %481 = vmatprep.subr.bf16.mxu0 %v480_v8  ;;  %v500_v25 = vpack.c.bf16 %v109_v23, %v108_v22  ;;  %v111_v26 = vld [vmem:[#allocation5 + $0x78] sm:$0xff]  ;;  %v204_v28 = vld [vmem:[#allocation7] sm:$0xff]  ;;  %v205_v29 = vld [vmem:[#allocation7 + $0x8] sm:$0xff] }
  0x3d   :  { %80 = vadd.xlane.f32.xlu1 %v77_v9  ;;  %v504_v27 = vpack.c.bf16 %v111_v26, %v110_v24  ;;  %v206_v30 = vld [vmem:[#allocation7 + $0x10] sm:$0xff]  ;;  %v508_v31 = vpack.c.bf16 %v205_v29, %v204_v28  ;;  %v207_v32 = vld [vmem:[#allocation7 + $0x18] sm:$0xff]  ;;  %v208_v34 = vld [vmem:[#allocation7 + $0x20] sm:$0xff]  ;;  %p632_p0 = pnand %p631_p13, %p625_p10 }
  0x3e   :  { %v512_v33 = vpack.c.bf16 %v207_v32, %v206_v30  ;;  %v209_v35 = vld [vmem:[#allocation7 + $0x28] sm:$0xff]  ;;  %v210_v57 = vld [vmem:[#allocation7 + $0x30] sm:$0xff]  ;;  %v211_v58 = vld [vmem:[#allocation7 + $0x38] sm:$0xff] }
  0x3f   :  { %483 = vmatpush3.bf16.msra.mxu0 %v480_v8  ;;  %509 = vmatprep.subr.bf16.mxu1 %v508_v31  ;;  %v516_v36 = vpack.c.bf16 %v209_v35, %v208_v34  ;;  %v520_v59 = vpack.c.bf16 %v211_v58, %v210_v57  ;;  %v212_v60 = vld [vmem:[#allocation7 + $0x40] sm:$0xff]  ;;  %v213_v61 = vld [vmem:[#allocation7 + $0x48] sm:$0xff]  ;;  %v214_v63 = vld [vmem:[#allocation7 + $0x50] sm:$0xff] }
  0x40   :  { %485 = vmatprep.subr.bf16.mxu0 %v484_v12  ;;  %511 = vmatpush3.bf16.msra.mxu1 %v508_v31  ;;  %v524_v62 = vpack.c.bf16 %v213_v61, %v212_v60  ;;  %v217_v3 = vld [vmem:[#allocation7 + $0x68] sm:$0xff]  ;;  %v218_v5 = vld [vmem:[#allocation7 + $0x70] sm:$0xff]  ;;  %v219_v6 = vld [vmem:[#allocation7 + $0x78] sm:$0xff] }
  0x41   :  { %513 = vmatprep.subr.bf16.mxu1 %v512_v33  ;;  %v536_v7 = vpack.c.bf16 %v219_v6, %v218_v5  ;;  %v366_v8 = vld [vmem:[%s791_s2] ss:$0 sm:$0xff] }
  0x42   :  { %v367_v23 = vld [vmem:[%s793_s4] ss:$0 sm:$0xff] }
  0x43   :  { %487 = vmatpush3.bf16.msra.mxu0 %v484_v12 }
  0x44   :  { %489 = vmatprep.subr.bf16.mxu0 %v488_v15  ;;  %515 = vmatpush3.bf16.msra.mxu1 %v512_v33 }
  0x45   :  { %517 = vmatprep.subr.bf16.mxu1 %v516_v36 }
  0x47   :  { %491 = vmatpush3.bf16.msra.mxu0 %v488_v15 }
  0x48   :  { %493 = vmatprep.subr.bf16.mxu0 %v492_v18  ;;  %519 = vmatpush3.bf16.msra.mxu1 %v516_v36 }
  0x49   :  { %521 = vmatprep.subr.bf16.mxu1 %v520_v59 }
  0x4b   :  { %495 = vmatpush3.bf16.msra.mxu0 %v492_v18 }
  0x4c   :  { %497 = vmatprep.subr.bf16.mxu0 %v496_v21  ;;  %523 = vmatpush3.bf16.msra.mxu1 %v520_v59 }
  0x4d   :  { %525 = vmatprep.subr.bf16.mxu1 %v524_v62 }
  0x4f   :  { %499 = vmatpush3.bf16.msra.mxu0 %v496_v21 }
  0x50   :  { %501 = vmatprep.subr.bf16.mxu0 %v500_v25  ;;  %527 = vmatpush3.bf16.msra.mxu1 %v524_v62 }
  0x53   :  { %503 = vmatpush3.bf16.msra.mxu0 %v500_v25 }
  0x54   :  { %505 = vmatprep.subr.bf16.mxu0 %v504_v27 }
  0x57   :  { %507 = vmatpush3.bf16.msra.mxu0 %v504_v27 }
  0xc4   :  { %v71_v37 = vpop.xlane.xlu0 %70 }
  0xc5   :  { %v74_v38 = vmul.f32 0.03125, %v71_v37 }
  0xc6   :  { %v79_v39 = vpop.xlane.xlu1 %78 }
  0xc7   :  { %v84_v40 = vmul.f32 %v74_v38, %v74_v38  ;;  %v82_v41 = vmul.f32 0.03125, %v79_v39  ;;  %v88_v51 = vsub.f32 %v750_v0, %v74_v38  ;;  %v215_v0 = vld [vmem:[#allocation7 + $0x58] sm:$0xff] }
  0xc8   :  { %v73_v42 = vpop.xlane.xlu0 %72  ;;  %v528_v2 = vpack.c.bf16 %v215_v0, %v214_v63 }
  0xc9   :  { %v86_v43 = vsub.f32 %v82_v41, %v84_v40  ;;  %v75_v44 = vmul.f32 0.03125, %v73_v42 }
  0xca   :  { %v81_v45 = vpop.xlane.xlu1 %80  ;;  %529 = vmatprep.subr.bf16.mxu1 %v528_v2 }
  0xcb   :  { %v90_v46 = vadd.f32 1e-05, %v86_v43  ;;  %v85_v47 = vmul.f32 %v75_v44, %v75_v44  ;;  %v83_v48 = vmul.f32 0.03125, %v81_v45  ;;  %v89_v54 = vsub.f32 %v752_v1, %v75_v44  ;;  %531 = vmatpush3.bf16.msra.mxu1 %v528_v2  ;;  %v216_v1 = vld [vmem:[#allocation7 + $0x60] sm:$0xff] }
  0xcc   :  { %v532_v4 = vpack.c.bf16 %v217_v3, %v216_v1 }
  0xcd   :  { %546 = vrsqrt.f32 %v90_v46  ;;  %v87_v49 = vsub.f32 %v83_v48, %v85_v47  ;;  %v368_v47 = vld [vmem:[%s794_s5] ss:$0 sm:$0xff] }
  0xce   :  { %533 = vmatprep.subr.bf16.mxu1 %v532_v4 }
  0xcf   :  { %v91_v50 = vadd.f32 1e-05, %v87_v49  ;;  %535 = vmatpush3.bf16.msra.mxu1 %v532_v4 }
  0xd0   :  { %537 = vmatprep.subr.bf16.mxu1 %v536_v7 }
  0xd1   :  { %548 = vrsqrt.f32 %v91_v50 }
  0xd3   :  { %539 = vmatpush3.bf16.msra.mxu1 %v536_v7 }
  0xd7   :  { %v547_v52 = vpop.eup %546 }
  0xd8   :  { %v94_v53 = vmul.f32 %v547_v52, %v88_v51  ;;  %v369_v51 = vld [vmem:[%s795_s6] ss:$0 sm:$0xff] }
  0xda   :  { %438 = vmatprep.mubr.f32.mxu0 %v94_v53 }
  0xdb   :  { %v549_v55 = vpop.eup %548 }
  0xdc   :  { %v95_v56 = vmul.f32 %v549_v55, %v89_v54 }
  0xde   :  { %439 = vmatmul.mubr.f32.vlgmr.msra.gmra.mrb[0].mxu0 %v95_v56 }
 0x1b1   :  { %v440_v9 = vpop.f32.mrb[0].mxu0 }
 0x1b2   :  { %v191_v10 = vadd.f32 %v440_v9, %v366_v8  ;;  %v185_v11 = vpop.f32.mrb[1].mxu0 }
 0x1b3   :  { %v186_v12 = vadd.f32 %v366_v8, %v185_v11 }
 0x1b4   :  { %v197_v13 = vmul.f32 0.70710677, %v191_v10  ;;  %v195_v20 = vmul.f32 0.5, %v191_v10 }
 0x1b5   :  { %v196_v14 = vmul.f32 0.70710677, %v186_v12  ;;  %v194_v18 = vmul.f32 0.5, %v186_v12 }
 0x1b6   :  { %550 = verf.f32 %v197_v13 }
 0x1b7   :  { %552 = verf.f32 %v196_v14 }
 0x1c0   :  { %v551_v15 = vpop.eup %550 }
 0x1c1   :  { %v553_v16 = vpop.eup %552  ;;  %v201_v17 = vadd.f32 1.0, %v551_v15 }
 0x1c2   :  { %v200_v19 = vadd.f32 1.0, %v553_v16 }
 0x1c3   :  { %v203_v22 = vmul.f32 %v201_v17, %v195_v20 }
 0x1c4   :  { %v202_v21 = vmul.f32 %v200_v19, %v194_v18 }
 0x1c6   :  { %473 = vmatprep.mubr.f32.mxu1 %v202_v21 }
 0x1c7   :  { %474 = vmatmul.mubr.f32.vlgmr.msra.gmra.mrb[0].mxu1 %v203_v22 }
 0x29a   :  { %v475_v24 = vpop.f32.mrb[0].mxu1 }
 0x29b   :  { %v299_v25 = vadd.f32 %v475_v24, %v367_v23  ;;  %v293_v26 = vpop.f32.mrb[1].mxu1 }
 0x29c   :  { %v294_v27 = vadd.f32 %v367_v23, %v293_v26 }
 0x29d   :  { %304 = vadd.xlane.f32.xlu1 %v299_v25  ;;  %v309_v28 = vmul.f32 %v299_v25, %v299_v25 }
 0x29e   :  { %302 = vadd.xlane.f32.xlu0 %v294_v27  ;;  %v308_v29 = vmul.f32 %v294_v27, %v294_v27 }
 0x2a1   :  { %312 = vadd.xlane.f32.xlu1 %v309_v28 }
 0x2a2   :  { %310 = vadd.xlane.f32.xlu0 %v308_v29 }
 0x32a   :  { %v305_v30 = vpop.xlane.xlu1 %304 }
 0x32b   :  { %v307_v31 = vmul.f32 0.015625, %v305_v30  ;;  %v303_v32 = vpop.xlane.xlu0 %302 }
 0x32c   :  { %v306_v33 = vmul.f32 0.015625, %v303_v32 }
 0x32d   :  { %v317_v35 = vmul.f32 %v307_v31, %v307_v31  ;;  %v321_v44 = vsub.f32 %v299_v25, %v307_v31 }
 0x32e   :  { %v313_v34 = vpop.xlane.xlu1 %312  ;;  %v316_v38 = vmul.f32 %v306_v33, %v306_v33  ;;  %v320_v46 = vsub.f32 %v294_v27, %v306_v33 }
 0x32f   :  { %v315_v36 = vmul.f32 0.015625, %v313_v34  ;;  %v311_v37 = vpop.xlane.xlu0 %310 }
 0x330   :  { %v314_v39 = vmul.f32 0.015625, %v311_v37 }
 0x331   :  { %v319_v40 = vsub.f32 %v315_v36, %v317_v35 }
 0x332   :  { %v318_v41 = vsub.f32 %v314_v39, %v316_v38 }
 0x333   :  { %v323_v42 = vadd.f32 1e-05, %v319_v40 }
 0x334   :  { %v322_v43 = vadd.f32 1e-05, %v318_v41 }
 0x335   :  { %554 = vrsqrt.f32 %v323_v42 }
 0x336   :  { %556 = vrsqrt.f32 %v322_v43 }
 0x33f   :  { %v555_v45 = vpop.eup %554 }
 0x340   :  { %v557_v48 = vpop.eup %556  ;;  %v327_v49 = vmul.f32 %v555_v45, %v321_v44 }
 0x341   :  { %v326_v50 = vmul.f32 %v557_v48, %v320_v46 }
 0x342   :  { %v336_v52 = vmul.f32 %v368_v47, %v327_v49 }
 0x343   :  { %v335_v53 = vmul.f32 %v368_v47, %v326_v50 }
 0x344   :  { %v345_v54 = vadd.f32 %v369_v51, %v336_v52 }
 0x345   :  { %v344_v55 = vadd.f32 %v369_v51, %v335_v53 }
 0x346   :  { %347 = vst [vmem:[#allocation8 + $0x8] sm:$0xff] %v345_v54 }
 0x347   :  { %346 = vst [vmem:[#allocation8] sm:$0xff] %v344_v55 }
 0x348   :  { %635 = shalt.err (!%p632_p0)
}
 0x349   :  { %s636_s6 = scalar_lea.hbm %s796_s7, 256 }
 0x34a   :  { %p637_p1 = scmp.ne.s32.totalorder %s796_s7, %s636_s6  ;;  %p640_p2 = scmp.lt.u32.totalorder %s636_s6, %s796_s7 }
 0x34c   :  { %p642_p3 = pnand %p640_p2, %p637_p1 }
 0x34e   :  { %645 = shalt.err (!%p642_p3)
}
 0x34f   :  { %359 = dma.vmem_to_hbm [thread:$0]  %s354_s22, 256, %s796_s7, [#allocation4], %s654_s13, %s654_s13, %s655_s14  }
 0x350   :  { %650 = dma.done.wait [#allocation4], 256  }
 0x351   :  { %651 = vsyncadd [#allocation4], 4294967040 }
 0x352   :  { %363 = vsyncpa [#allocation3], 1 }
 0x353   :  { %364 = vsyncpa [#allocation6], 1 }
 0x354   :  { %365 = vsyncpa [#allocation4], 1 }

</bundles_post_ra>
